<compile_context>
chip_gen: v5e
topology: v5e:2x2
jax: 0.10.0
libtpu: 0.0.40
codegen_flags: <defaults>
</compile_context>

<pallas_src>
import functools
from types import SimpleNamespace

import jax
import jax.numpy as jnp
from jax import lax
from jax.experimental import pallas as pl
from jax.experimental.pallas import tpu as pltpu

LRELU_SLOPE = 0.1

_HALO = 128                      # halo block width along time (1 vreg of lanes)
_DEFAULT_T_TILE = 1024           # time tile (multiple of 128); amortizes halos
_VMEM_LIMIT = 48 * 1024 * 1024   # < v7x 64 MiB physical; >> v5e/v6e scoped default
_MATMUL_DTYPE = jnp.bfloat16     # MXU-native; accumulation stays f32
_ACT_DTYPE = jnp.bfloat16        # intermediate activation storage dtype


def _round_up(x, m):
    return (x + m - 1) // m * m


# ---------------------------------------------------------------------------
# In-kernel helpers
# ---------------------------------------------------------------------------
def _fill_window(xp_ref, xc_ref, xn_ref, win_ref, *, t_tile, t_valid,
                 pre_scale, pre_lrelu, slope):
    """Write [prev-halo | current | next-halo] into the bf16 VMEM scratch,
    applying the fused pre-scale / leaky_relu per piece (no full-window value
    materialization).  Columns outside the valid signal [0, T) are zeroed
    (torch zero-'same' padding) only on boundary tiles (pl.when-gated)."""
    def act(v):
        if pre_scale != 1.0:
            v = v * pre_scale
        if pre_lrelu:
            v = jnp.where(v >= 0, v, slope * v)
        return v.astype(win_ref.dtype)

    win_ref[:, :_HALO] = act(xp_ref[0])
    win_ref[:, _HALO:_HALO + t_tile] = act(xc_ref[0])
    win_ref[:, _HALO + t_tile:] = act(xn_ref[0])

    t = pl.program_id(1)
    width = t_tile + 2 * _HALO
    # Only the first tile (g < 0 in its left halo) and tiles whose window
    # reaches past t_valid need the mask; interior tiles skip it entirely.
    needs_mask = (t == 0) | ((t + 1) * t_tile + _HALO > t_valid)

    @pl.when(needs_mask)
    def _():
        g = t * t_tile - _HALO + lax.broadcasted_iota(jnp.int32, (1, width), 1)
        keep = (g >= 0) & (g < t_valid)
        win_ref[...] = jnp.where(keep, win_ref[...], 0.0).astype(win_ref.dtype)


def _tap_matmul(win_ref, w_ref, *, K, dilation, c_in, t_tile, fold):
    """Dilated 'same' conv of the assembled window as MXU matmul(s); slices
    are taken directly from the VMEM scratch ref."""
    pad_l = dilation * (K - 1) // 2
    start = _HALO - pad_l
    if fold or K == 1:
        # one deep contraction (K*C_in) — fills the MXU for shallow channels
        if K == 1:
            patch = win_ref[:, start:start + t_tile]
        else:
            patch = jnp.concatenate(
                [win_ref[:, start + k * dilation:start + k * dilation + t_tile]
                 for k in range(K)], axis=0)
        return jnp.dot(w_ref[...], patch, preferred_element_type=jnp.float32)
    acc = jnp.zeros((w_ref.shape[0], t_tile), jnp.float32)
    for k in range(K):
        wk = w_ref[:, k * c_in:(k + 1) * c_in]
        col = win_ref[:, start + k * dilation:start + k * dilation + t_tile]
        acc = acc + jnp.dot(wk, col, preferred_element_type=jnp.float32)
    return acc


# ---------------------------------------------------------------------------
# Pallas kernels
# ---------------------------------------------------------------------------
def _conv_kernel(*refs, K, dilation, c_in, t_tile, t_valid,
                 pre_lrelu, slope, pre_scale, fold, n_res):
    xp, xc, xn, w_ref, b_ref = refs[:5]
    res_refs = refs[5:5 + n_res]
    o_ref = refs[5 + n_res]
    win_ref = refs[6 + n_res]

    _fill_window(xp, xc, xn, win_ref, t_tile=t_tile, t_valid=t_valid,
                 pre_scale=pre_scale, pre_lrelu=pre_lrelu, slope=slope)
    acc = _tap_matmul(win_ref, w_ref, K=K, dilation=dilation, c_in=c_in,
                      t_tile=t_tile, fold=fold)
    acc = acc + b_ref[...]                               # f32 bias
    for r in res_refs:                                   # fused residual / branch sum
        acc = acc + r[0].astype(jnp.float32)
    o_ref[0] = acc.astype(o_ref.dtype)


def _ri_spectral_kernel(xp, xc, xn, la_ref, wr_ref, br_ref, wi_ref, bi_ref,
                        r_ref, i_ref, re_ref, im_ref, win_ref, *,
                        K_r, K_i, c_in, t_tile, t_valid, slope, pre_scale,
                        fold_r, fold_i):
    """PSP R/I output convs + spectral elementwise math, fused (exp / rsqrt
    ride the EUP slot)."""
    _fill_window(xp, xc, xn, win_ref, t_tile=t_tile, t_valid=t_valid,
                 pre_scale=pre_scale, pre_lrelu=True, slope=slope)
    R = _tap_matmul(win_ref, wr_ref, K=K_r, dilation=1, c_in=c_in,
                    t_tile=t_tile, fold=fold_r) + br_ref[...]
    I = _tap_matmul(win_ref, wi_ref, K=K_i, dilation=1, c_in=c_in,
                    t_tile=t_tile, fold=fold_i) + bi_ref[...]
    amp = jnp.exp(la_ref[0].astype(jnp.float32))
    inv = lax.rsqrt(R * R + I * I + 1e-30)               # eps: no NaN at R=I=0
    r_ref[0] = R.astype(r_ref.dtype)
    i_ref[0] = I.astype(i_ref.dtype)
    re_ref[0] = (amp * R * inv).astype(re_ref.dtype)     # exp(logamp)*cos(atan2)
    im_ref[0] = (amp * I * inv).astype(im_ref.dtype)     # exp(logamp)*sin(atan2)


# ---------------------------------------------------------------------------
# Wrappers (BlockSpecs / grid)
# ---------------------------------------------------------------------------
def _halo_specs(c_in, t_tile, nt):
    r = t_tile // _HALO
    prev = pl.BlockSpec((1, c_in, _HALO),
                        lambda b, t: (b, 0, jnp.maximum(t * r - 1, 0)))
    cur = pl.BlockSpec((1, c_in, t_tile), lambda b, t: (b, 0, t))
    nxt = pl.BlockSpec((1, c_in, _HALO),
                       lambda b, t: (b, 0, jnp.minimum((t + 1) * r, nt * r - 1)))
    return prev, cur, nxt


def conv1d_same(x, w, b, *, dilation=1, pre_lrelu=False, slope=LRELU_SLOPE,
                pre_scale=1.0, residuals=(), t_valid=None, t_tile=None,
                out_dtype=None):
    """'same'-padded dilated Conv1d.  x: (B, C_in, Tr) with Tr % t_tile == 0.
    Output channels are padded to a multiple of 8; caller slices if needed."""
    B, C_in, Tr = x.shape
    C_out, C_w, K = w.shape
    assert K % 2 == 1, "only odd kernel sizes are supported ('same' conv)"
    pad_l = dilation * (K - 1) // 2
    assert pad_l <= _HALO, "conv halo exceeds the 128-wide halo block"
    if t_tile is None:
        t_tile = min(_DEFAULT_T_TILE, _round_up(Tr, _HALO))
    assert t_tile % _HALO == 0 and Tr % t_tile == 0
    nt = Tr // t_tile
    if t_valid is None:
        t_valid = Tr
    if out_dtype is None:
        out_dtype = x.dtype

    if C_w < C_in:                                  # channel-padded activations
        w = jnp.pad(w, ((0, 0), (0, C_in - C_w), (0, 0)))
    C_out_p = _round_up(C_out, 8)                   # sublane-dense output stores
    if C_out_p != C_out:
        w = jnp.pad(w, ((0, C_out_p - C_out), (0, 0), (0, 0)))
        b = jnp.pad(b, (0, C_out_p - C_out))
    # bf16 weights on the host (halves VMEM / HBM for the weight blocks)
    w2d = jnp.transpose(w, (0, 2, 1)).reshape(C_out_p, K * C_in).astype(_MATMUL_DTYPE)
    b2 = b.reshape(C_out_p, 1).astype(jnp.float32)

    prev, cur, nxt = _halo_specs(C_in, t_tile, nt)
    w_spec = pl.BlockSpec((C_out_p, K * C_in), lambda bb, tt: (0, 0))
    b_spec = pl.BlockSpec((C_out_p, 1), lambda bb, tt: (0, 0))
    out_spec = pl.BlockSpec((1, C_out_p, t_tile), lambda bb, tt: (bb, 0, tt))

    in_specs = [prev, cur, nxt, w_spec, b_spec]
    inputs = [x, x, x, w2d, b2]
    for r_in in residuals:                          # fused residual / branch-sum
        if r_in.shape[1] < C_out_p:
            r_in = jnp.pad(r_in, ((0, 0), (0, C_out_p - r_in.shape[1]), (0, 0)))
        in_specs.append(pl.BlockSpec((1, C_out_p, t_tile),
                                     lambda bb, tt: (bb, 0, tt)))
        inputs.append(r_in)

    kernel = functools.partial(
        _conv_kernel, K=K, dilation=dilation, c_in=C_in, t_tile=t_tile,
        t_valid=t_valid, pre_lrelu=pre_lrelu, slope=slope, pre_scale=pre_scale,
        fold=(K * C_in <= 1024), n_res=len(residuals))

    return pl.pallas_call(
        kernel,
        out_shape=jax.ShapeDtypeStruct((B, C_out_p, Tr), out_dtype),
        grid=(B, nt),
        in_specs=in_specs,
        out_specs=out_spec,
        scratch_shapes=[pltpu.VMEM((C_in, t_tile + 2 * _HALO), _MATMUL_DTYPE)],
        compiler_params=pltpu.CompilerParams(
            # "parallel" on both axes: megacore sharding across the 2 TCs (v7x)
            dimension_semantics=("parallel", "parallel"),
            vmem_limit_bytes=_VMEM_LIMIT),
    )(*inputs)


def psp_output_spectral(pha, logamp, wr, br, wi, bi, *, pre_scale, t_valid, t_tile):
    """Fused PSP_output_{R,I} convs + real/imag spectral math."""
    B, C_in, Tr = pha.shape
    F_out, C_wr, K_r = wr.shape
    _, C_wi, K_i = wi.shape
    assert K_r % 2 == 1 and K_i % 2 == 1
    assert (K_r - 1) // 2 <= _HALO and (K_i - 1) // 2 <= _HALO
    assert Tr % t_tile == 0
    nt = Tr // t_tile

    if C_wr < C_in:
        wr = jnp.pad(wr, ((0, 0), (0, C_in - C_wr), (0, 0)))
    if C_wi < C_in:
        wi = jnp.pad(wi, ((0, 0), (0, C_in - C_wi), (0, 0)))
    F_p = _round_up(F_out, 8)
    if F_p != F_out:
        wr = jnp.pad(wr, ((0, F_p - F_out), (0, 0), (0, 0)))
        br = jnp.pad(br, (0, F_p - F_out))
        wi = jnp.pad(wi, ((0, F_p - F_out), (0, 0), (0, 0)))
        bi = jnp.pad(bi, (0, F_p - F_out))
    assert logamp.shape == (B, F_p, Tr)
    wr2 = jnp.transpose(wr, (0, 2, 1)).reshape(F_p, K_r * C_in).astype(_MATMUL_DTYPE)
    wi2 = jnp.transpose(wi, (0, 2, 1)).reshape(F_p, K_i * C_in).astype(_MATMUL_DTYPE)
    br2 = br.reshape(F_p, 1).astype(jnp.float32)
    bi2 = bi.reshape(F_p, 1).astype(jnp.float32)

    prev, cur, nxt = _halo_specs(C_in, t_tile, nt)
    f_spec = pl.BlockSpec((1, F_p, t_tile), lambda bb, tt: (bb, 0, tt))
    wr_spec = pl.BlockSpec((F_p, K_r * C_in), lambda bb, tt: (0, 0))
    wi_spec = pl.BlockSpec((F_p, K_i * C_in), lambda bb, tt: (0, 0))
    b_spec = pl.BlockSpec((F_p, 1), lambda bb, tt: (0, 0))

    kernel = functools.partial(
        _ri_spectral_kernel, K_r=K_r, K_i=K_i, c_in=C_in, t_tile=t_tile,
        t_valid=t_valid, slope=0.01, pre_scale=pre_scale,
        fold_r=(K_r * C_in <= 1024), fold_i=(K_i * C_in <= 1024))

    out_sd = jax.ShapeDtypeStruct((B, F_p, Tr), jnp.float32)
    return pl.pallas_call(
        kernel,
        out_shape=(out_sd, out_sd, out_sd, out_sd),
        grid=(B, nt),
        in_specs=[prev, cur, nxt, f_spec, wr_spec, b_spec, wi_spec, b_spec],
        out_specs=(f_spec, f_spec, f_spec, f_spec),
        scratch_shapes=[pltpu.VMEM((C_in, t_tile + 2 * _HALO), _MATMUL_DTYPE)],
        compiler_params=pltpu.CompilerParams(
            dimension_semantics=("parallel", "parallel"),
            vmem_limit_bytes=_VMEM_LIMIT),
    )(pha, pha, pha, logamp, wr2, br2, wi2, bi2)


# ---------------------------------------------------------------------------
# Model pieces (plain-JAX orchestration around the Pallas kernels)
# ---------------------------------------------------------------------------
def resblock_fwd(x, p, dilations, *, accum=None, t_valid, t_tile):
    """Res[LReLU-DConv-LReLU-Conv]x3; LReLU, residual add and (optionally) the
    running branch sum (`accum`) are fused into the conv kernels."""
    for i in range(3):
        xt = conv1d_same(x, p["w1"][i], p["b1"][i], dilation=dilations[i],
                         pre_lrelu=True, slope=LRELU_SLOPE,
                         t_valid=t_valid, t_tile=t_tile)
        extra = [accum] if (i == 2 and accum is not None) else []
        x = conv1d_same(xt, p["w2"][i], p["b2"][i], dilation=1,
                        pre_lrelu=True, slope=LRELU_SLOPE,
                        residuals=[x] + extra,
                        t_valid=t_valid, t_tile=t_tile)
    return x


def hann_window(n):
    # torch.hann_window default: periodic=True
    return 0.5 - 0.5 * jnp.cos(2.0 * jnp.pi * jnp.arange(n) / n)


def istft(spec, n_fft, hop, win_len, window):
    """torch.istft(center=True) equivalent. spec: (B, n_fft//2+1, T) complex.
    Overlap-add vectorized as one scatter-add (no per-frame Python loop)."""
    if window.shape[0] < n_fft:                       # center-pad window to n_fft
        lpad = (n_fft - window.shape[0]) // 2
        window = jnp.pad(window, (lpad, n_fft - window.shape[0] - lpad))
    frames = jnp.fft.irfft(spec, n=n_fft, axis=1)     # (B, n_fft, T)
    frames = frames * window[None, :, None]
    B, _, T = frames.shape
    out_len = n_fft + hop * (T - 1)
    idx = (jnp.arange(T)[:, None] * hop + jnp.arange(n_fft)[None, :]).reshape(-1)
    vals = jnp.transpose(frames, (0, 2, 1)).reshape(B, -1)
    y = jnp.zeros((B, out_len), jnp.float32).at[:, idx].add(vals)
    env = jnp.zeros((out_len,), jnp.float32).at[idx].add(
        jnp.tile(window * window, T))
    y = y / jnp.where(env > 1e-11, env, 1.0)
    pad = n_fft // 2
    return y[:, pad: out_len - pad]                   # length = hop*(T-1)


def generator_fwd(mel, params, h, *, t_tile=None):
    B, _, T = mel.shape
    if t_tile is None:
        t_tile = min(_DEFAULT_T_TILE, _round_up(T, _HALO))  # lane-dense tile
    Tr = _round_up(T, t_tile)
    mel_p = jnp.pad(mel, ((0, 0), (0, 0), (0, Tr - T)))     # one-time rounding pad
    cfg = dict(t_valid=T, t_tile=t_tile)
    freq = h.n_fft // 2 + 1
    n_asp = len(h.ASP_resblock_kernel_sizes)
    n_psp = len(h.PSP_resblock_kernel_sizes)

    # ----- ASP branch (log-amplitude) -----
    logamp = conv1d_same(mel_p, params["asp_in_w"], params["asp_in_b"],
                         out_dtype=_ACT_DTYPE, **cfg)
    # branch sums are fused into the last conv of each extra resblock
    logamps = resblock_fwd(logamp, params["asp_res"][0],
                           h.ASP_resblock_dilation_sizes[0], **cfg)
    for j in range(1, n_asp):
        logamps = resblock_fwd(logamp, params["asp_res"][j],
                               h.ASP_resblock_dilation_sizes[j],
                               accum=logamps, **cfg)
    # /n_asp and F.leaky_relu (slope 0.01) fused into the output conv
    logamp_p = conv1d_same(logamps, params["asp_out_w"], params["asp_out_b"],
                           pre_lrelu=True, slope=0.01, pre_scale=1.0 / n_asp,
                           out_dtype=jnp.float32, **cfg)

    # ----- PSP branch (phase) -----
    pha = conv1d_same(mel_p, params["psp_in_w"], params["psp_in_b"],
                      out_dtype=_ACT_DTYPE, **cfg)
    phas = resblock_fwd(pha, params["psp_res"][0],
                        h.PSP_resblock_dilation_sizes[0], **cfg)
    for j in range(1, n_psp):
        phas = resblock_fwd(pha, params["psp_res"][j],
                            h.PSP_resblock_dilation_sizes[j],
                            accum=phas, **cfg)
    # fused: R/I output convs (+ /n_psp, lrelu 0.01) + exp/rsqrt spectral math
    R_p, I_p, real_p, imag_p = psp_output_spectral(
        phas, logamp_p, params["psp_r_w"], params["psp_r_b"],
        params["psp_i_w"], params["psp_i_b"], pre_scale=1.0 / n_psp, **cfg)

    # slice channel / time padding off
    logamp = logamp_p[:, :freq, :T]
    R = R_p[:, :freq, :T]
    I = I_p[:, :freq, :T]
    real = real_p[:, :freq, :T]
    imag = imag_p[:, :freq, :T]

    pha_out = jnp.arctan2(I, R)      # TODO(synk): atan2 kept in plain JAX
    spec = real + 1j * imag          # exp(logamp) * exp(1j * pha)
    audio = istft(spec, h.n_fft, h.hop_size, h.win_size, hann_window(h.win_size))
    return logamp, pha_out, real, imag, audio[:, None, :]


# ---------------------------------------------------------------------------
# Deterministic parameter construction
# ---------------------------------------------------------------------------
def _conv_params(key, c_out, c_in, k, std=0.01):
    kw, kb = jax.random.split(key)
    w = std * jax.random.normal(kw, (c_out, c_in, k), jnp.float32)
    b = 0.01 * jax.random.normal(kb, (c_out,), jnp.float32)
    return w, b


def _resblock_params(key, channels, kernel_size):
    ks = jax.random.split(key, 6)
    w1, b1, w2, b2 = [], [], [], []
    for i in range(3):
        w, b = _conv_params(ks[i], channels, channels, kernel_size)
        w1.append(w); b1.append(b)
        w, b = _conv_params(ks[3 + i], channels, channels, kernel_size)
        w2.append(w); b2.append(b)
    return {"w1": w1, "b1": b1, "w2": w2, "b2": b2}


def make_params(key, h):
    freq = h.n_fft // 2 + 1
    keys = jax.random.split(key, 16)
    p = {}
    p["asp_in_w"], p["asp_in_b"] = _conv_params(keys[0], h.ASP_channel, h.num_mels,
                                                h.ASP_input_conv_kernel_size)
    p["psp_in_w"], p["psp_in_b"] = _conv_params(keys[1], h.PSP_channel, h.num_mels,
                                                h.PSP_input_conv_kernel_size)
    p["asp_res"] = [_resblock_params(keys[2 + i], h.ASP_channel, k)
                    for i, k in enumerate(h.ASP_resblock_kernel_sizes)]
    p["psp_res"] = [_resblock_params(keys[6 + i], h.PSP_channel, k)
                    for i, k in enumerate(h.PSP_resblock_kernel_sizes)]
    p["asp_out_w"], p["asp_out_b"] = _conv_params(keys[10], freq, h.ASP_channel,
                                                  h.ASP_output_conv_kernel_size)
    p["psp_r_w"], p["psp_r_b"] = _conv_params(keys[11], freq, h.PSP_channel,
                                              h.PSP_output_R_conv_kernel_size)
    p["psp_i_w"], p["psp_i_b"] = _conv_params(keys[12], freq, h.PSP_channel,
                                              h.PSP_output_I_conv_kernel_size)
    return p


# ---------------------------------------------------------------------------
if __name__ == "__main__":
    h = SimpleNamespace(
        num_mels=8,
        n_fft=16,
        hop_size=4,
        win_size=16,
        ASP_channel=16,
        PSP_channel=16,
        ASP_input_conv_kernel_size=7,
        PSP_input_conv_kernel_size=7,
        ASP_output_conv_kernel_size=5,
        PSP_output_R_conv_kernel_size=5,
        PSP_output_I_conv_kernel_size=5,
        ASP_resblock_kernel_sizes=[3, 5],
        ASP_resblock_dilation_sizes=[[1, 3, 5], [1, 3, 5]],
        PSP_resblock_kernel_sizes=[3, 5],
        PSP_resblock_dilation_sizes=[[1, 3, 5], [1, 3, 5]],
        causal=False,
        use_fc=False,
    )

    key = jax.random.PRNGKey(0)
    k_param, k_mel = jax.random.split(key)
    params = make_params(k_param, h)

    B, T = 2, 16
    mel = jax.random.normal(k_mel, (B, h.num_mels, T), jnp.float32)  # NCL, like PyTorch

    logamp, pha, real, imag, audio = generator_fwd(mel, params, h)
    jax.block_until_ready((logamp, pha, real, imag, audio))

    freq = h.n_fft // 2 + 1
    assert logamp.shape == (B, freq, T)
    assert pha.shape == (B, freq, T)
    assert real.shape == (B, freq, T)
    assert imag.shape == (B, freq, T)
    assert audio.shape == (B, 1, h.hop_size * (T - 1))
    assert all(bool(jnp.isfinite(a).all()) for a in (logamp, pha, real, imag, audio))

    print("KERNEL_OK")
</pallas_src>

<mosaic_0001>
module attributes {stable_mosaic.version = 11 : i64} {
  func.func @_conv_kernel(%arg0: i32, %arg1: i32, %arg2: memref<1x8x128xf32, #tpu.memory_space<vmem>>, %arg3: memref<1x8x128xf32, #tpu.memory_space<vmem>>, %arg4: memref<1x8x128xf32, #tpu.memory_space<vmem>>, %arg5: memref<16x56xbf16, #tpu.memory_space<vmem>>, %arg6: memref<16x1xf32, #tpu.memory_space<vmem>>, %arg7: memref<1x16x128xbf16, #tpu.memory_space<vmem>>, %arg8: memref<8x384xbf16, #tpu.memory_space<vmem>>) attributes {dimension_semantics = [#tpu.dimension_semantics<parallel>, #tpu.dimension_semantics<parallel>], iteration_bounds = array<i64: 2, 1>, scalar_prefetch = 0 : i64, scratch_operands = 1 : i64, tpu.core_type = #tpu.core_type<tc>, window_params = [{transform_indices = @transform_0, window_bounds = array<i64: 1, 8, 128>}, {transform_indices = @transform_1, window_bounds = array<i64: 1, 8, 128>}, {transform_indices = @transform_2, window_bounds = array<i64: 1, 8, 128>}, {pipeline_mode = #tpu.pipeline_mode<synchronous>, transform_indices = @transform_3, window_bounds = array<i64: 16, 56>}, {pipeline_mode = #tpu.pipeline_mode<synchronous>, transform_indices = @transform_4, window_bounds = array<i64: 16, 1>}, {transform_indices = @transform_5, window_bounds = array<i64: 1, 16, 128>}]} {
    %c0 = arith.constant 0 : index
    %c0_0 = arith.constant 0 : index
    %c0_1 = arith.constant 0 : index
    %0 = vector.load %arg2[%c0, %c0_0, %c0_1] : memref<1x8x128xf32, #tpu.memory_space<vmem>>, vector<1x8x128xf32>
    %1 = vector.shape_cast %0 : vector<1x8x128xf32> to vector<8x128xf32>
    %2 = arith.truncf %1 : vector<8x128xf32> to vector<8x128xbf16>
    %c0_2 = arith.constant 0 : index
    %c0_3 = arith.constant 0 : index
    %3 = vector.load %arg8[%c0_2, %c0_3] : memref<8x384xbf16, #tpu.memory_space<vmem>>, vector<8x128xbf16>
    tpu.vector_store %arg8[%c0_2, %c0_3], %2 {strides = array<i32>} : memref<8x384xbf16, #tpu.memory_space<vmem>>, vector<8x128xbf16>,
    %c0_4 = arith.constant 0 : index
    %c0_5 = arith.constant 0 : index
    %c0_6 = arith.constant 0 : index
    %4 = vector.load %arg3[%c0_4, %c0_5, %c0_6] : memref<1x8x128xf32, #tpu.memory_space<vmem>>, vector<1x8x128xf32>
    %5 = vector.shape_cast %4 : vector<1x8x128xf32> to vector<8x128xf32>
    %6 = arith.truncf %5 : vector<8x128xf32> to vector<8x128xbf16>
    %c0_7 = arith.constant 0 : index
    %c128 = arith.constant 128 : index
    %7 = vector.load %arg8[%c0_7, %c128] : memref<8x384xbf16, #tpu.memory_space<vmem>>, vector<8x128xbf16>
    tpu.vector_store %arg8[%c0_7, %c128], %6 {strides = array<i32>} : memref<8x384xbf16, #tpu.memory_space<vmem>>, vector<8x128xbf16>,
    %c0_8 = arith.constant 0 : index
    %c0_9 = arith.constant 0 : index
    %c0_10 = arith.constant 0 : index
    %8 = vector.load %arg4[%c0_8, %c0_9, %c0_10] : memref<1x8x128xf32, #tpu.memory_space<vmem>>, vector<1x8x128xf32>
    %9 = vector.shape_cast %8 : vector<1x8x128xf32> to vector<8x128xf32>
    %10 = arith.truncf %9 : vector<8x128xf32> to vector<8x128xbf16>
    %c0_11 = arith.constant 0 : index
    %c256 = arith.constant 256 : index
    %11 = vector.load %arg8[%c0_11, %c256] : memref<8x384xbf16, #tpu.memory_space<vmem>>, vector<8x128xbf16>
    tpu.vector_store %arg8[%c0_11, %c256], %10 {strides = array<i32>} : memref<8x384xbf16, #tpu.memory_space<vmem>>, vector<8x128xbf16>,
    %c0_i32 = arith.constant 0 : i32
    %12 = arith.cmpi eq, %arg1, %c0_i32 : i32
    %c1_i32 = arith.constant 1 : i32
    %13 = arith.addi %arg1, %c1_i32 : i32
    %c128_i32 = arith.constant 128 : i32
    %14 = arith.muli %13, %c128_i32 : i32
    %c128_i32_12 = arith.constant 128 : i32
    %15 = arith.addi %14, %c128_i32_12 : i32
    %c16_i32 = arith.constant 16 : i32
    %16 = arith.cmpi sgt, %15, %c16_i32 : i32
    %17 = arith.ori %12, %16 : i1
    %18 = arith.extui %17 : i1 to i32
    %c0_i32_13 = arith.constant 0 : i32
    %19 = arith.cmpi ne, %18, %c0_i32_13 : i32
    scf.if %19 {
      %c128_i32_29 = arith.constant 128 : i32
      %37 = arith.muli %arg1, %c128_i32_29 : i32
      %c128_i32_30 = arith.constant 128 : i32
      %38 = arith.subi %37, %c128_i32_30 : i32
      %39 = tpu.iota {dimensions = array<i32: 1>} : vector<1x384xi32>
      %40 = vector.broadcast %38 : i32 to vector<1x384xi32>
      %41 = arith.addi %40, %39 : vector<1x384xi32>
      %c0_i32_31 = arith.constant 0 : i32
      %42 = vector.broadcast %c0_i32_31 : i32 to vector<1x384xi32>
      %43 = arith.cmpi sge, %41, %42 : vector<1x384xi32>
      %c16_i32_32 = arith.constant 16 : i32
      %44 = vector.broadcast %c16_i32_32 : i32 to vector<1x384xi32>
      %45 = arith.cmpi slt, %41, %44 : vector<1x384xi32>
      %46 = arith.andi %43, %45 : vector<1x384xi1>
      %c0_33 = arith.constant 0 : index
      %c0_34 = arith.constant 0 : index
      %47 = vector.load %arg8[%c0_33, %c0_34] : memref<8x384xbf16, #tpu.memory_space<vmem>>, vector<8x384xbf16>
      %cst_35 = arith.constant 0.000000e+00 : f32
      %48 = arith.truncf %cst_35 : f32 to bf16
      %49 = vector.shape_cast %46 : vector<1x384xi1> to vector<1x384xi1>
      %50 = vector.broadcast %49 : vector<1x384xi1> to vector<8x384xi1>
      %51 = vector.broadcast %48 : bf16 to vector<8x384xbf16>
      %52 = arith.select %50, %47, %51 : vector<8x384xi1>, vector<8x384xbf16>
      %c0_36 = arith.constant 0 : index
      %c0_37 = arith.constant 0 : index
      %53 = vector.load %arg8[%c0_36, %c0_37] : memref<8x384xbf16, #tpu.memory_space<vmem>>, vector<8x384xbf16>
      tpu.vector_store %arg8[%c0_36, %c0_37], %52 {strides = array<i32>} : memref<8x384xbf16, #tpu.memory_space<vmem>>, vector<8x384xbf16>,
    } else {
    }
    %c0_14 = arith.constant 0 : index
    %c125 = arith.constant 125 : index
    %20 = vector.load %arg8[%c0_14, %c125] : memref<8x384xbf16, #tpu.memory_space<vmem>>, vector<8x128xbf16>
    %c0_15 = arith.constant 0 : index
    %c126 = arith.constant 126 : index
    %21 = vector.load %arg8[%c0_15, %c126] : memref<8x384xbf16, #tpu.memory_space<vmem>>, vector<8x128xbf16>
    %c0_16 = arith.constant 0 : index
    %c127 = arith.constant 127 : index
    %22 = vector.load %arg8[%c0_16, %c127] : memref<8x384xbf16, #tpu.memory_space<vmem>>, vector<8x128xbf16>
    %c0_17 = arith.constant 0 : index
    %c128_18 = arith.constant 128 : index
    %23 = vector.load %arg8[%c0_17, %c128_18] : memref<8x384xbf16, #tpu.memory_space<vmem>>, vector<8x128xbf16>
    %c0_19 = arith.constant 0 : index
    %c129 = arith.constant 129 : index
    %24 = vector.load %arg8[%c0_19, %c129] : memref<8x384xbf16, #tpu.memory_space<vmem>>, vector<8x128xbf16>
    %c0_20 = arith.constant 0 : index
    %c130 = arith.constant 130 : index
    %25 = vector.load %arg8[%c0_20, %c130] : memref<8x384xbf16, #tpu.memory_space<vmem>>, vector<8x128xbf16>
    %c0_21 = arith.constant 0 : index
    %c131 = arith.constant 131 : index
    %26 = vector.load %arg8[%c0_21, %c131] : memref<8x384xbf16, #tpu.memory_space<vmem>>, vector<8x128xbf16>
    %27 = tpu.concatenate %20, %21, %22, %23, %24, %25, %26 in 0 : vector<8x128xbf16>, vector<8x128xbf16>, vector<8x128xbf16>, vector<8x128xbf16>, vector<8x128xbf16>, vector<8x128xbf16>, vector<8x128xbf16> -> vector<56x128xbf16>
    %c0_22 = arith.constant 0 : index
    %c0_23 = arith.constant 0 : index
    %28 = vector.load %arg5[%c0_22, %c0_23] : memref<16x56xbf16, #tpu.memory_space<vmem>>, vector<16x56xbf16>
    %cst = arith.constant dense<0.000000e+00> : vector<16x128xf32>
    %29 = tpu.matmul %28, %27, %cst {dimension_numbers = #tpu.dot_dimension_numbers<[1], [0], [0], [1], [0, 0, 1, 1], [], []>} : vector<16x56xbf16>, vector<56x128xbf16>, vector<16x128xf32> -> vector<16x128xf32>
    %c0_24 = arith.constant 0 : index
    %c0_25 = arith.constant 0 : index
    %30 = vector.load %arg6[%c0_24, %c0_25] : memref<16x1xf32, #tpu.memory_space<vmem>>, vector<16x1xf32>
    %31 = vector.broadcast %30 : vector<16x1xf32> to vector<16x128xf32>
    %32 = arith.addf %29, %31 : vector<16x128xf32>
    %33 = arith.truncf %32 : vector<16x128xf32> to vector<16x128xbf16>
    %c0_26 = arith.constant 0 : index
    %c0_27 = arith.constant 0 : index
    %c0_28 = arith.constant 0 : index
    %34 = vector.load %arg7[%c0_26, %c0_27, %c0_28] : memref<1x16x128xbf16, #tpu.memory_space<vmem>>, vector<1x16x128xbf16>
    %35 = vector.shape_cast %34 : vector<1x16x128xbf16> to vector<16x128xbf16>
    %36 = vector.shape_cast %33 : vector<16x128xbf16> to vector<1x16x128xbf16>
    tpu.vector_store %arg7[%c0_26, %c0_27, %c0_28], %36 {strides = array<i32>} : memref<1x16x128xbf16, #tpu.memory_space<vmem>>, vector<1x16x128xbf16>,
    return
  }
  func.func @transform_0(%arg0: i32, %arg1: i32) -> (i32, i32, i32) {
    %c1_i32 = arith.constant 1 : i32
    %0 = arith.muli %arg1, %c1_i32 : i32
    %c1_i32_0 = arith.constant 1 : i32
    %1 = arith.subi %0, %c1_i32_0 : i32
    %c0_i32 = arith.constant 0 : i32
    %2 = arith.maxsi %1, %c0_i32 : i32
    %c0_i32_1 = arith.constant 0 : i32
    %c0_i32_2 = arith.constant 0 : i32
    return %arg0, %c0_i32_1, %2 : i32, i32, i32
  }
  func.func @transform_1(%arg0: i32, %arg1: i32) -> (i32, i32, i32) {
    %c0_i32 = arith.constant 0 : i32
    %c0_i32_0 = arith.constant 0 : i32
    return %arg0, %c0_i32, %arg1 : i32, i32, i32
  }
  func.func @transform_2(%arg0: i32, %arg1: i32) -> (i32, i32, i32) {
    %c1_i32 = arith.constant 1 : i32
    %0 = arith.addi %arg1, %c1_i32 : i32
    %c1_i32_0 = arith.constant 1 : i32
    %1 = arith.muli %0, %c1_i32_0 : i32
    %c0_i32 = arith.constant 0 : i32
    %2 = arith.minsi %1, %c0_i32 : i32
    %c0_i32_1 = arith.constant 0 : i32
    %c0_i32_2 = arith.constant 0 : i32
    return %arg0, %c0_i32_1, %2 : i32, i32, i32
  }
  func.func @transform_3(%arg0: i32, %arg1: i32) -> (i32, i32) {
    %c0_i32 = arith.constant 0 : i32
    %c0_i32_0 = arith.constant 0 : i32
    %c0_i32_1 = arith.constant 0 : i32
    return %c0_i32, %c0_i32_0 : i32, i32
  }
  func.func @transform_4(%arg0: i32, %arg1: i32) -> (i32, i32) {
    %c0_i32 = arith.constant 0 : i32
    %c0_i32_0 = arith.constant 0 : i32
    %c0_i32_1 = arith.constant 0 : i32
    return %c0_i32, %c0_i32_0 : i32, i32
  }
  func.func @transform_5(%arg0: i32, %arg1: i32) -> (i32, i32, i32) {
    %c0_i32 = arith.constant 0 : i32
    %c0_i32_0 = arith.constant 0 : i32
    return %arg0, %c0_i32, %arg1 : i32, i32, i32
  }
}

</mosaic_0001>

<bundles_post_ra>
// kernel: tpu_custom_call.1
= control target key start
LH: loop header
LB: loop body
LE: loop exit
PB: predicated region body
PF: predicated region fallthrough
CT: control target
= control target key end

     0   :  { %s1262_s0 = inlined_call_operand.vmem [shape: f32[2,8,128], index: 0, kind: input, shape index: {}]   ;;  %s1263_s1 = inlined_call_operand.hbm [shape: f32[2,8,128], index: 1, kind: input, shape index: {}]   ;;  %s1264_s2 = inlined_call_operand.hbm [shape: f32[2,8,128], index: 2, kind: input, shape index: {}]   ;;  %s1265_s3 = inlined_call_operand.hbm [shape: bf16[16,56], index: 3, kind: input, shape index: {}]   ;;  %s1266_s4 = inlined_call_operand.vmem [shape: f32[16,1], index: 4, kind: input, shape index: {}]   ;;  %s1267_s5 = inlined_call_operand.hbm [shape: bf16[2,16,128], index: 5, kind: output, shape index: {}]  }
   0x1   :  { %1272 = sst [smem:[#allocation19_spill]] %s1265_s3 }
   0x2   :  { %10 = vsyncpa [#allocation4], 0 }
   0x3   :  { %12 = vsyncpa [#allocation4 + $0x1], 0 }
   0x4   :  { %13 = vsyncpa [#allocation7], 0 }
   0x5   :  { %15 = vsyncpa [#allocation7 + $0x1], 0 }
   0x6   :  { %16 = vsyncpa [#allocation5], 0 }
   0x7   :  { %18 = vsyncpa [#allocation5 + $0x1], 0  ;;  %s1076_s18 = smov 0   ;;  %s1078_s19 = smov 0  }
   0x8   :  { %s1080_s20 = smov 0   ;;  %s1082_s21 = smov 0  }
   0x9   :  { %s1084_s22 = smov 0   ;;  %s1086_s23 = smov 0  }
   0xa LB: > { %1273 = sst [smem:[#allocation14_spill]] %s1018_s20  ;;  %s1107_s24 = sadd.s32 4294967295, %s1030_s23   ;;  %s1030_s23 = sphi %s1086_s23, %s24_s23   ;;  %s1026_s22 = sphi %s1084_s22, %s1288_s22   ;;  %s1022_s21 = sphi %s1082_s21, %s1287_s21   ;;  %s1018_s20 = sphi %s1080_s20, %s1286_s20   ;;  %s1014_s19 = sphi %s1078_s19, %s1290_s19   ;;  %s1010_s18 = sphi %s1076_s18, %s1289_s18  }
   0xb   : > { %1274 = sst [smem:[#allocation15_spill]] %s1026_s22  ;;  %p721_p0 = scmp.ge.s32.totalorder %s1030_s23, 1 }
   0xc   : > { %p93_p1 = scmp.eq.s32.totalorder %s1107_s24, 0  ;;  %p207_p2 = scmp.lt.s32.totalorder %s1030_s23, 3 }
   0xd   : > { %s1275_s3 = sld [smem:[#allocation19_spill]]  ;;  %s1032_s29 = smov [#allocation8]  }
   0xe   : > { %p1115_p3 = pnand %p721_p0, %p207_p2  ;;  %s220_s30 = sshll.u32 %s1032_s29, 4  ;;  %s221_s30 = int_to_ptr.vmem [resolvable:$true] %s220_s30 }
   0xf   : > { %p723_p6 = scmp.ge.s32.totalorder %s1030_s23, 2  ;;  %s1033_s6 = smov 64  }
  0x10   : > { %p766_p4 = pneg %p1115_p3  ;;  %s1034_s7 = smov 4  }
  0x11   : > { %s720_s8 = sadd.s32 4294967294, %s1030_s23   ;;  %s36_s9 = sadd.s32 1, %s1026_s22 }
  0x12   : > { %p767_p5 = pnand %p766_p4, %p93_p1  ;;  %s79_s10 = sadd.s32 1, %s1018_s20 }
  0x13   : > { %s218_s27 = sshll.u32 %s1275_s3, 4  ;;  %p38_p7 = scmp.ge.s32.totalorder %s36_s9, 2  ;;  %s219_s27 = int_to_ptr.hbm [resolvable:$true] %s218_s27 }
  0x14   : > { %769 = dma.hbm_to_vmem [thread:$0]  (!%p767_p5), %s219_s27, 128, %s221_s30, [#allocation7], %s1033_s6, %s1033_s6, %s1034_s7  }
  0x15   : > { %p86_p8 = scmp.ne.s32.totalorder %s1018_s20, %s1014_s19  ;;  %p87_p9 = scmp.eq.s32.totalorder %s1030_s23, 0 }
  0x16   : > { %p92_p10 = scmp.ne.s32.totalorder %s1014_s19, %s1010_s18  ;;  %s1292_s9 = smov (%p38_p7, %s36_s9), 0 }
  0x17   : > { %1277 = sst [smem:[#allocation16_spill]] %s1292_s9  ;;  %p1134_p11 = por %p87_p9, %p86_p8 }
  0x18   : > { %p1140_p12 = por %p93_p1, %p92_p10  ;;  %s74_s13 = ssub.s32 %s1026_s22, %s1292_s9 }
  0x19   : > { %p194_p13 = scmp.eq.s32.totalorder %s1107_s24, 1  ;;  %p77_p0 = scmp.eq.s32.totalorder %s74_s13, 0 }
  0x1a   : > { %p200_p2 = scmp.eq.s32.totalorder %s720_s8, 1  ;;  %p782_p5 = scmp.lt.s32.totalorder %s1030_s23, 2 }
  0x1b   : > { %p1147_p4 = por %p194_p13, %p86_p8  ;;  %s253_s17 = sand.u32 1, %s1018_s20  }
  0x1c   : > { %s1153_s15 = scalar_select %p77_p0, %s1018_s20, %s79_s10  }
  0x1d   : > { %p1155_p7 = por %p200_p2, %p92_p10  ;;  %s724_s25 = sshll.u32 %s253_s17, 3 }
  0x1e   : > { %1281 = sst [smem:[#allocation17_spill]] %s1153_s15  ;;  %s725_s26 = sshll.u32 %s1026_s22, 3 }
  0x1f   : > { %s1282_s16 = scalar_select %p1155_p7, 1, 0 }
  0x20   : > { %s262_s30 = scalar_lea.hbm %s1263_s1, %s725_s26  ;;  %s257_s6 = scalar_lea.vmem [#allocation3], %s724_s25 }
  0x21   : > { %1283 = sst [smem:[#allocation18_spill]] %s1282_s16  ;;  %s266_s7 = sshll.u32 %s257_s6, 4  ;;  %s267_s7 = int_to_ptr.vmem [resolvable:$true] %s266_s7 }
  0x22   : > { %s264_s8 = sshll.u32 %s262_s30, 4  ;;  %p771_p8 = pnand %p782_p5, %p1134_p11  ;;  %s265_s8 = int_to_ptr.hbm [resolvable:$true] %s264_s8 }
  0x23   : > { %s285_s3 = scalar_lea.hbm %s1264_s2, %s725_s26  ;;  %s273_s9 = sand.u32 1, %s1030_s23  }
  0x24   : > { %s254_s15 = scalar_lea.sflag [#allocation4], %s253_s17  ;;  %s287_s20 = sshll.u32 %s285_s3, 4  ;;  %s288_s20 = int_to_ptr.hbm [resolvable:$true] %s287_s20 }
  0x25   : > { %773 = dma.hbm_to_vmem [thread:$0]  (!%p771_p8), %s265_s8, 128, %s267_s7, %s254_s15  }
  0x26   : > { %s277_s22 = scalar_lea.vmem [#allocation6], %s724_s25  ;;  %s274_s27 = scalar_lea.sflag [#allocation7], %s273_s9 }
  0x27   : > { %s289_s16 = sshll.u32 %s277_s22, 4  ;;  %298 = sbr.rel (%p1115_p3) target bundleno = 476 (0x1dc), region = 40  ;;  %s290_s16 = int_to_ptr.vmem [resolvable:$true] %s289_s16 }
  0x28   : > { %776 = dma.hbm_to_vmem [thread:$0]  (!%p771_p8), %s288_s20, 128, %s290_s16, %s274_s27  }
  0x29   : > { %s1173_s11 = sand.u32 (!%p1115_p3), 1, %s1014_s19  }
  0x2a   : > { %s1176_s26 = sshll.u32 (!%p1115_p3), %s1173_s11, 3  ;;  %s301_s15 = scalar_lea.sflag (!%p1115_p3), [#allocation4], %s1173_s11 }
  0x2b   : > { %s304_s3 = scalar_lea.vmem (!%p1115_p3), [#allocation3], %s1176_s26 }
  0x2c   : > { %993 = dma.done.wait (%p1140_p12), %s301_s15, 128  }
  0x2d   : > { %995 = vsyncadd (%p1140_p12), %s301_s15, 4294967168  ;;  %s310_s20 = sand.u32 1, %s1107_s24   ;;  %s314_s28 = scalar_lea.vmem [#allocation6], %s1176_s26 }
  0x2e   : > { %s311_s22 = scalar_lea.sflag [#allocation7], %s310_s20 }
  0x2f   : > { %997 = dma.done.wait (%p1140_p12), %s311_s22, 128  }
  0x30   : > { %999 = vsyncadd (%p1140_p12), %s311_s22, 4294967168 }
  0x31   : > { %1001 = dma.done.wait (%p93_p1), [#allocation7], 128  }
  0x32   : > { %1003 = vsyncadd (%p93_p1), [#allocation7], 4294967168  ;;  %p365_p3 = scmp.lt.s32.totalorder %s1022_s21, 1  ;;  %v399_v0 = vlaneseq  ;;  %v382_v5 = vld [vmem:[%s304_s3] sm:$0xff]  ;;  %v385_v6 = vld [vmem:[%s314_s28] sm:$0xff]  ;;  %vm1035_vm1 = vmmov 0  }
  0x33   : > { %v386_v8 = vpack.c.bf16 %v385_v6, %v385_v6  ;;  %vm425_vm3 = vmpackc.low %vm1035_vm1, %vm1035_vm1  ;;  %s1036_s24 = smov 124   ;;  %s1037_s12 = smov 122   ;;  %vm478_vm4 = vcmask 1043456   ;;  %vm470_vm5 = vcmask 1006592   ;;  %vm464_vm6 = vcmask 1014784   ;;  %v498_v46 = vld [vmem:[%s1266_s4] sm:$0xff] }
  0x34   : > { %s366_s9 = scalar_select %p365_p3, %s1022_s21, 1  ;;  %v400_v1 = vand.u32 127, %v399_v0  ;;  %vm476_vm7 = vcmask 998400   ;;  %vm448_vm8 = vcmask 1031168   ;;  %vm442_vm9 = vcmask 1039360   ;;  %v499_v47 = vld [vmem:[%s1266_s4 + $0x8] sm:$0xff] }
  0x35   : > { %387 = vst [vmem:[#allocation2 + $0x8] sm:$0xf] %v386_v8  ;;  %s1038_s30 = smov 123   ;;  %s1039_s6 = smov 126   ;;  %v1043_v48 = vmov 0   ;;  %vm537_vm10 = vcmask 23552  }
  0x36   : > { %s733_s16 = sshll.u32 %s366_s9, 3  ;;  %v401_v2 = vadd.s32 128, %v400_v1  ;;  %s1040_s7 = smov 125   ;;  %847 = vset.pattern.permute.xlu1 %v1043_v48  ;;  %848 = vset.pattern.permute.xlu2 %v1043_v48  ;;  %v744_v62 = vld [vmem:[#allocation8] sm:$0xff]  ;;  %vm545_vm11 = vcmask 457728  }
  0x37   : > { %s371_s29 = scalar_lea.vmem %s1262_s0, %s733_s16  ;;  %s1041_s8 = smov 127   ;;  %849 = vset.pattern.permute.xlu0 %v1043_v48 }
  0x38   : > { %v405_v3 = vadd.s32 4294967168, %v401_v2  ;;  %v379_v4 = vld [vmem:[%s371_s29] sm:$0xff]  ;;  %s1042_s10 = smov 3   ;;  %s745_s20 = sshll.u32 %s1022_s21, 3 }
  0x39   : > { %v749_v7 = vpack.c.bf16 %v382_v5, %v379_v4  ;;  %s583_s9 = scalar_lea.hbm %s1267_s5, %s745_s20  ;;  %s361_s16 = scalar_lea.vmem [#allocation9], %s1176_s26 }
  0x3a   : > { %vm411_vm0 = vcmp.lt.s32.totalorder %v405_v3, 16  ;;  %s1225_s17 = sshll.u32 %s361_s16, 4  ;;  %s586_s25 = sshll.u32 %s583_s9, 4  ;;  %s585_s17 = int_to_ptr.vmem [resolvable:$true] %s1225_s17  ;;  %s587_s25 = int_to_ptr.hbm [resolvable:$true] %s586_s25 }
  0x3b   : > { %vm424_vm2 = vmpackc.low %vm411_vm0, %vm1035_vm1  ;;  %s571_s21 = scalar_lea.sflag [#allocation5], %s1173_s11  ;;  %s954_s29 = sshra.s32 %s587_s25, 4  ;;  %s955_s29 = int_to_ptr.hbm [resolvable:$true] %s954_s29 }
  0x3c   : > { %v426_v9 = vsel %vm424_vm2, %v749_v7, 0  ;;  %v417_v10 = vld [vmem:[#allocation2 + $0x8] sm:$0xf]  ;;  %p961_p11 = scmp.lt.s32.totalorder %s955_s29, %s1267_s5 }
  0x3d   : > { %428 = vst [vmem:[#allocation2] sm:$0xff] %v426_v9  ;;  %v427_v11 = vsel %vm425_vm3, %v417_v10, 0  ;;  %v435_v18 = vunpack.c.h.b16 %v426_v9  ;;  %v434_v19 = vunpack.c.l.b16 %v426_v9 }
  0x3e   : > { %429 = vst [vmem:[#allocation2 + $0x8] sm:$0xf] %v427_v11 }
  0x3f   : > { %v437_v21 = vpack.c.b16 %v435_v18, %v435_v18  ;;  %v436_v22 = vpack.c.b16 %v434_v19, %v434_v19 }
  0x44   : > { %v431_v17 = vld [vmem:[#allocation2 + $0x4] sm:$0xf] }
  0x45   : > { %v432_v12 = vld [vmem:[#allocation2 + $0x4] sm:$0xff]  ;;  %v451_v20 = vunpack.c.l.b16 %v431_v17 }
  0x46   : > { %v456_v13 = vunpack.c.l.b16 %v432_v12  ;;  %v457_v15 = vunpack.c.h.b16 %v432_v12 }
  0x47   : > { %v452_v23 = vpack.c.b16 %v451_v20, %v451_v20 }
  0x48   : > { %v458_v14 = vpack.c.b16 %v456_v13, %v456_v13  ;;  %v459_v16 = vpack.c.b16 %v457_v15, %v457_v15 }
  0x4a   : > { %460 = vrot.lane.b32.xlu1 %v458_v14, %s1036_s24  ;;  %472 = vrot.lane.b32.xlu0 %v458_v14, %s1037_s12 }
  0x4b   : > { %466 = vrot.lane.b32.xlu2 %v458_v14, %s1038_s30 }
  0x52   : > { %462 = vrot.lane.b32.xlu1 %v459_v16, %s1036_s24  ;;  %474 = vrot.lane.b32.xlu0 %v459_v16, %s1037_s12  ;;  %s956_s24 = scalar_lea.hbm %s955_s29, 8 }
  0x53   : > { %468 = vrot.lane.b32.xlu2 %v459_v16, %s1038_s30  ;;  %p957_p1 = scmp.ne.s32.totalorder %s955_s29, %s956_s24  ;;  %s960_s30 = scalar_lea.hbm %s1267_s5, 16 }
  0x54   : > { %p962_p12 = scmp.lt.s32.totalorder %s960_s30, %s956_s24 }
  0x55   : > { %p958_p9 = pnand %p957_p1, %p1147_p4 }
  0x56   : > { %p963_p13 = por %p962_p12, %p961_p11 }
  0x57   : > { %p959_p10 = pneg %p958_p9 }
  0x59   : > { %p964_p0 = pnand %p963_p13, %p959_p10 }
  0x5a   : > { %446 = vrot.lane.b32.xlu1 %v437_v21, %s1039_s6  ;;  %444 = vrot.lane.b32.xlu0 %v436_v22, %s1039_s6 }
  0x5b   : > { %453 = vrot.lane.b32.xlu2 %v452_v23, %s1040_s7 }
  0x62   : > { %440 = vrot.lane.b32.xlu1 %v437_v21, %s1041_s8  ;;  %438 = vrot.lane.b32.xlu0 %v436_v22, %s1041_s8 }
  0xa5   : > { %v467_v24 = vpop.permute.xlu2 %466 }
  0xad   : > { %v469_v28 = vpop.permute.xlu2 %468 }
  0xae   : > { %v471_v31 = vsel %vm470_vm5, %v467_v24, %v469_v28 }
  0xb5   : > { %v454_v35 = vpop.permute.xlu2 %453 }
  0xbc   : > { %v461_v25 = vpop.permute.xlu1 %460  ;;  %v473_v26 = vpop.permute.xlu0 %472 }
  0xbd   : > { %533 = vrot.lane.b32.xlu2 %v473_v26, %s1042_s10  ;;  %v492_v27 = vsel %vm478_vm4, %v461_v25, %v467_v24 }
  0xbe   : > { %529 = vrot.lane.b32.xlu1 %v492_v27, %s1042_s10 }
  0xc4   : > { %v463_v29 = vpop.permute.xlu1 %462  ;;  %v475_v30 = vpop.permute.xlu0 %474 }
  0xc5   : > { %v465_v32 = vsel %vm464_vm6, %v461_v25, %v463_v29  ;;  %v477_v33 = vsel %vm476_vm7, %v473_v26, %v475_v30 }
  0xc6   : > { %535 = vrot.lane.b32.xlu0 %v477_v33, %s1042_s10  ;;  %v495_v34 = vsel %vm478_vm4, %v465_v32, %v471_v31 }
  0xc7   : > { %531 = vrot.lane.b32.xlu2 %v495_v34, %s1042_s10 }
  0xcc   : > { %v447_v36 = vpop.permute.xlu1 %446  ;;  %v445_v37 = vpop.permute.xlu0 %444 }
  0xcd   : > { %v449_v38 = vsel %vm448_vm8, %v445_v37, %v447_v36  ;;  %v489_v39 = vsel %vm478_vm4, %v447_v36, %v454_v35 }
  0xce   : > { %527 = vrot.lane.b32.xlu1 %v489_v39, %s1042_s10  ;;  %v487_v40 = vsel %vm478_vm4, %v449_v38, %v454_v35 }
  0xcf   : > { %525 = vrot.lane.b32.xlu0 %v487_v40, %s1042_s10 }
  0xd4   : > { %v441_v41 = vpop.permute.xlu1 %440  ;;  %v439_v42 = vpop.permute.xlu0 %438 }
  0xd5   : > { %v443_v43 = vsel %vm442_vm9, %v439_v42, %v441_v41  ;;  %v484_v44 = vsel %vm478_vm4, %v437_v21, %v441_v41 }
  0xd6   : > { %v481_v45 = vsel %vm478_vm4, %v436_v22, %v443_v43  ;;  %502 = vperm.xlu1 %847, %v498_v46  }
  0xd7   : > { %523 = vrot.lane.b32.xlu0 %v484_v44, %s1042_s10  ;;  %521 = vrot.lane.b32.xlu2 %v481_v45, %s1042_s10 }
  0xdf   : > { %507 = vperm.xlu2 %848, %v499_v47  }
 0x117   : > { %v534_v49 = vpop.permute.xlu2 %533 }
 0x121   : > { %v532_v54 = vpop.permute.xlu2 %531 }
 0x130   : > { %v530_v50 = vpop.permute.xlu1 %529 }
 0x131   : > { %v540_v55 = vsel %vm537_vm10, %v530_v50, %v532_v54  ;;  %v522_v59 = vpop.permute.xlu2 %521 }
 0x138   : > { %v536_v51 = vpop.permute.xlu0 %535 }
 0x139   : > { %v541_v52 = vsel %vm537_vm10, %v534_v49, %v536_v51  ;;  %v508_v1 = vpop.permute.xlu2 %507 }
 0x13a   : > { %v550_v53 = vsel %vm478_vm4, %v541_v52, 0 }
 0x13b   : > { %556 = vmatpush.bf16.msra.mxu0 %v550_v53 }
 0x13f   : > { %557 = vmatpush.bf16.msra.mxu0 %v540_v55 }
 0x140   : > { %v528_v56 = vpop.permute.xlu1 %527 }
 0x141   : > { %v526_v57 = vpop.permute.xlu0 %525 }
 0x142   : > { %v539_v58 = vsel %vm537_vm10, %v526_v57, %v528_v56 }
 0x143   : > { %558 = vmatpush.bf16.msra.mxu0 %v539_v58 }
 0x148   : > { %v503_v0 = vpop.permute.xlu1 %502 }
 0x149   : > { %v524_v60 = vpop.permute.xlu0 %523 }
 0x14a   : > { %v538_v61 = vsel %vm537_vm10, %v522_v59, %v524_v60 }
 0x14b   : > { %559 = vmatpush.bf16.msra.mxu0 %v538_v61 }
 0x14e   : > { %738 = vmatmul.msk.bf16.vlgmr.msra.gmra.mxu0 %vm545_vm11, %v744_v62 }
 0x1cb   : > { %v561_v63 = vpop.f32.mrf.mxu0 }
 0x1cc   : > { %v562_v3 = vadd.f32 %v561_v63, %v503_v0 }
 0x1d3   : > { %v563_v2 = vpop.f32.mrf.mxu0 }
 0x1d4   : > { %v564_v4 = vadd.f32 %v563_v2, %v508_v1 }
 0x1d6   : > { %v754_v5 = vpack.c.bf16 %v564_v4, %v562_v3 }
 0x1d8   : > { %755 = vst [vmem:[%s361_s16] sm:$0xff] %v754_v5  }
 0x1d9   : > { %967 = shalt.err (!%p964_p0)
}
 0x1da   : > { %s1044_s11 = smov 64   ;;  %s1045_s8 = smov 4  }
 0x1db   : > { %764 = dma.vmem_to_hbm [thread:$0]  (%p1147_p4), %s585_s17, 128, %s587_s25, %s571_s21, %s1044_s11, %s1044_s11, %s1045_s8  }
 0x1dc PF: > { %s601_s13 = sand.u32 1, %s1010_s18   ;;  %p778_p2 = pnand %p723_p6, %p1155_p7 }
 0x1dd   : > { %s602_s27 = scalar_lea.sflag [#allocation5], %s601_s13 }
 0x1de   : > { %p779_p5 = pneg %p778_p2 }
 0x1e0   : > { %1005 = dma.done.wait (%p779_p5), %s602_s27, 128  }
 0x1e1   : > { %1007 = vsyncadd (%p779_p5), %s602_s27, 4294967168  ;;  %s24_s23 = sadd.s32 1, %s1030_s23   ;;  %s1285_s15 = sld [smem:[#allocation14_spill]] }
 0x1e2   : > { %p21_p8 = scmp.ge.s32.totalorder %s24_s23, 4   ;;  %s1286_s20 = sld [smem:[#allocation17_spill]] }
 0x1e3   : > { %s1287_s21 = sld [smem:[#allocation15_spill]]  ;;  %s1289_s18 = smov %s1014_s19 }
 0x1e4   : > { %s1288_s22 = sld [smem:[#allocation16_spill]]  ;;  %23 = sbr.rel (!%p21_p8) target bundleno = 10 (0xa), region = 109 }
 0x1e7   : > { %s1290_s19 = smov %s1285_s15 }
 0x1e9   :  { %608 = vsyncpa [#allocation4], 1 }
 0x1ea   :  { %610 = vsyncpa [#allocation4 + $0x1], 1 }
 0x1eb   :  { %611 = vsyncpa [#allocation7], 1 }
 0x1ec   :  { %613 = vsyncpa [#allocation7 + $0x1], 1 }
 0x1ed   :  { %614 = vsyncpa [#allocation5], 1 }
 0x1ee   :  { %616 = vsyncpa [#allocation5 + $0x1], 1 }

</bundles_post_ra>
